<compile_context>
chip_gen: v5e
topology: v5e:2x2
jax: 0.10.0
libtpu: 0.0.40
codegen_flags: <defaults>
</compile_context>

<pallas_src>
import functools

import jax
import jax.numpy as jnp
from jax.experimental import pallas as pl
from jax.experimental.pallas import tpu as pltpu


def _round_up(a: int, b: int) -> int:
    return ((a + b - 1) // b) * b


def _linear_kernel_direct(x_ref, wt_ref, o_ref, *, precision, compute_dtype):
    # o_ref is f32 and resident across the k axis (its index_map ignores k):
    # accumulate in place, no scratch and no finalize copy.
    @pl.when(pl.program_id(2) == 0)
    def _():
        o_ref[...] = jnp.zeros_like(o_ref)

    x = x_ref[...]
    w = wt_ref[...]
    if compute_dtype is not None:
        x = x.astype(compute_dtype)
        w = w.astype(compute_dtype)
    o_ref[...] += jnp.dot(
        x, w, preferred_element_type=jnp.float32, precision=precision
    )


def _linear_kernel_acc(x_ref, wt_ref, o_ref, acc_ref, *, precision, compute_dtype):
    # Non-f32 output: accumulate in an f32 VMEM scratch, cast once at the end.
    k = pl.program_id(2)

    @pl.when(k == 0)
    def _():
        acc_ref[...] = jnp.zeros_like(acc_ref)

    x = x_ref[...]
    w = wt_ref[...]
    if compute_dtype is not None:
        x = x.astype(compute_dtype)
        w = w.astype(compute_dtype)
    acc_ref[...] += jnp.dot(
        x, w, preferred_element_type=jnp.float32, precision=precision
    )

    @pl.when(k == pl.num_programs(2) - 1)
    def _():
        o_ref[...] = acc_ref[...].astype(o_ref.dtype)


def prepare_weight(weight, *, max_tk=2048):
    """One-time layout plumbing: W (N, K) -> W.T laid out as (Kp, N), K zero-padded
    to a 128-multiple (single K block when it fits in max_tk). Call once per weight
    (module init), NOT per forward call."""
    _, K = weight.shape
    k_aligned = _round_up(K, 128)
    Kp = k_aligned if k_aligned <= max_tk else _round_up(K, max_tk)
    wt = weight.T  # (K, N), lane-dense in N
    if Kp != K:
        wt = jnp.pad(wt, ((0, Kp - K), (0, 0)))
    return wt


@functools.partial(jax.jit, static_argnames=("tm", "tn", "max_tk", "compute_dtype"))
def mock_te_linear(x, wt_padded, *, tm=512, tn=512, max_tk=2048, compute_dtype=None):
    """y = x @ W.T where wt_padded = prepare_weight(W) has shape (Kp, N)."""
    orig_shape = x.shape
    K = orig_shape[-1]
    x2 = x.reshape(-1, K)  # flatten leading dims -> (M, K)
    M = x2.shape[0]
    Kp, N = wt_padded.shape
    assert Kp >= K and Kp % 128 == 0, "wt_padded must come from prepare_weight"

    # Only K needs zero-padding for correctness; no-op when K is already aligned.
    if Kp != K:
        x2 = jnp.pad(x2, ((0, 0), (0, Kp - K)))

    # K tile: single block when it fits, else the largest 128-multiple dividing Kp.
    if Kp <= max_tk:
        tk = Kp
    else:
        tk = max_tk
        while Kp % tk != 0:
            tk -= 128

    # Adapt M/N tiles down for small problems (sublane x8 / lane x128 alignment).
    tm_eff = min(tm, _round_up(M, 8))
    tn_eff = min(tn, _round_up(N, 128))

    # v7x megacore: if the parallel (i, j) grid would be 1x1, split N into >= 2
    # 128-aligned tiles so both TensorCores get work.
    if pl.cdiv(M, tm_eff) * pl.cdiv(N, tn_eff) == 1 and tn_eff >= 256:
        tn_eff = _round_up(tn_eff // 2, 128)

    grid = (pl.cdiv(M, tm_eff), pl.cdiv(N, tn_eff), Kp // tk)

    out_dtype = x.dtype
    # Full-f32 MXU matmul to match torch f32 fidelity unless a bf16 path is requested.
    precision = (
        jax.lax.Precision.HIGHEST
        if (compute_dtype is None and out_dtype == jnp.float32)
        else None
    )

    if out_dtype == jnp.float32:
        kernel = functools.partial(
            _linear_kernel_direct, precision=precision, compute_dtype=compute_dtype
        )
        scratch_shapes = []
    else:
        kernel = functools.partial(
            _linear_kernel_acc, precision=precision, compute_dtype=compute_dtype
        )
        scratch_shapes = [pltpu.VMEM((tm_eff, tn_eff), jnp.float32)]

    out = pl.pallas_call(
        kernel,
        out_shape=jax.ShapeDtypeStruct((M, N), out_dtype),
        grid_spec=pltpu.PrefetchScalarGridSpec(
            num_scalar_prefetch=0,
            grid=grid,
            in_specs=[
                pl.BlockSpec((tm_eff, tk), lambda i, j, k: (i, k)),   # x tile
                pl.BlockSpec((tk, tn_eff), lambda i, j, k: (k, j)),   # W.T tile
            ],
            out_specs=pl.BlockSpec((tm_eff, tn_eff), lambda i, j, k: (i, j)),
            scratch_shapes=scratch_shapes,
        ),
        compiler_params=pltpu.CompilerParams(
            dimension_semantics=("parallel", "parallel", "arbitrary"),
            # Worst-case tile set (512 x 512 x 2048 f32, double-buffered) is ~19 MiB;
            # 48 MiB leaves headroom and stays under v7x's 64 MiB physical VMEM while
            # still being generous for v5e/v6e (128 MiB physical).
            vmem_limit_bytes=48 * 1024 * 1024,
        ),
    )(x2, wt_padded)

    return out.reshape(*orig_shape[:-1], N)


if __name__ == "__main__":
    # Small shapes consistent with the module's forward:
    # batch=2, seq=8 -> 16 token rows, in_features=32, out_features=64.
    in_features = 32
    out_features = 64
    batch, seq = 2, 8

    key = jax.random.PRNGKey(0)
    kx, kw = jax.random.split(key)
    x = jax.random.normal(kx, (batch, seq, in_features), dtype=jnp.float32)
    # Same layout convention as nn.Parameter(torch.randn(out_features, in_features)).
    weight = jax.random.normal(kw, (out_features, in_features), dtype=jnp.float32)

    # One-time weight layout (module-init time), NOT part of the per-call path.
    wt = jax.block_until_ready(prepare_weight(weight))

    y = mock_te_linear(x, wt)
    y = jax.block_until_ready(y)

    # Correctness check against the plain JAX reference: x @ W.T (full f32).
    y_ref = jnp.matmul(x, weight.T, precision=jax.lax.Precision.HIGHEST)
    assert y.shape == (batch, seq, out_features)
    assert jnp.allclose(y, y_ref, atol=1e-4, rtol=1e-4), float(
        jnp.max(jnp.abs(y - y_ref))
    )

    print("KERNEL_OK")
</pallas_src>

<mosaic_0001>
module attributes {stable_mosaic.version = 11 : i64} {
  func.func @_linear_kernel_direct(%arg0: i32, %arg1: i32, %arg2: i32, %arg3: memref<16x128xf32, #tpu.memory_space<vmem>>, %arg4: memref<128x128xf32, #tpu.memory_space<vmem>>, %arg5: memref<16x128xf32, #tpu.memory_space<vmem>>) attributes {dimension_semantics = [#tpu.dimension_semantics<parallel>, #tpu.dimension_semantics<parallel>, #tpu.dimension_semantics<arbitrary>], iteration_bounds = array<i64: 1, 1, 1>, scalar_prefetch = 0 : i64, scratch_operands = 0 : i64, tpu.core_type = #tpu.core_type<tc>, window_params = [{transform_indices = @transform_0, window_bounds = array<i64: 16, 128>}, {transform_indices = @transform_1, window_bounds = array<i64: 128, 128>}, {transform_indices = @transform_2, window_bounds = array<i64: 16, 128>}]} {
    %c0_i32 = arith.constant 0 : i32
    %0 = arith.cmpi eq, %arg2, %c0_i32 : i32
    %1 = arith.extui %0 : i1 to i32
    %c0_i32_0 = arith.constant 0 : i32
    %2 = arith.cmpi ne, %1, %c0_i32_0 : i32
    scf.if %2 {
      %cst_8 = arith.constant 0.000000e+00 : f32
      %9 = vector.broadcast %cst_8 : f32 to vector<16x128xf32>
      %c0_9 = arith.constant 0 : index
      %c0_10 = arith.constant 0 : index
      %10 = vector.load %arg5[%c0_9, %c0_10] : memref<16x128xf32, #tpu.memory_space<vmem>>, vector<16x128xf32>
      tpu.vector_store %arg5[%c0_9, %c0_10], %9 {strides = array<i32>} : memref<16x128xf32, #tpu.memory_space<vmem>>, vector<16x128xf32>,
    } else {
    }
    %c0 = arith.constant 0 : index
    %c0_1 = arith.constant 0 : index
    %3 = vector.load %arg3[%c0, %c0_1] : memref<16x128xf32, #tpu.memory_space<vmem>>, vector<16x128xf32>
    %c0_2 = arith.constant 0 : index
    %c0_3 = arith.constant 0 : index
    %4 = vector.load %arg4[%c0_2, %c0_3] : memref<128x128xf32, #tpu.memory_space<vmem>>, vector<128x128xf32>
    %c0_4 = arith.constant 0 : index
    %c0_5 = arith.constant 0 : index
    %5 = vector.load %arg5[%c0_4, %c0_5] : memref<16x128xf32, #tpu.memory_space<vmem>>, vector<16x128xf32>
    %cst = arith.constant dense<0.000000e+00> : vector<16x128xf32>
    %6 = tpu.matmul %3, %4, %cst {dimension_numbers = #tpu.dot_dimension_numbers<[1], [0], [0], [1], [0, 0, 1, 1], [], []>, precision = #tpu.contract_precision<fp32>} : vector<16x128xf32>, vector<128x128xf32>, vector<16x128xf32> -> vector<16x128xf32>
    %7 = arith.addf %5, %6 : vector<16x128xf32>
    %c0_6 = arith.constant 0 : index
    %c0_7 = arith.constant 0 : index
    %8 = vector.load %arg5[%c0_6, %c0_7] : memref<16x128xf32, #tpu.memory_space<vmem>>, vector<16x128xf32>
    tpu.vector_store %arg5[%c0_6, %c0_7], %7 {strides = array<i32>} : memref<16x128xf32, #tpu.memory_space<vmem>>, vector<16x128xf32>,
    return
  }
  func.func @transform_0(%arg0: i32, %arg1: i32, %arg2: i32) -> (i32, i32) {
    %c0_i32 = arith.constant 0 : i32
    return %arg0, %arg2 : i32, i32
  }
  func.func @transform_1(%arg0: i32, %arg1: i32, %arg2: i32) -> (i32, i32) {
    %c0_i32 = arith.constant 0 : i32
    return %arg2, %arg1 : i32, i32
  }
  func.func @transform_2(%arg0: i32, %arg1: i32, %arg2: i32) -> (i32, i32) {
    %c0_i32 = arith.constant 0 : i32
    return %arg0, %arg1 : i32, i32
  }
}

</mosaic_0001>

<bundles_post_ra>
// kernel: mock_te_linear.1
= control target key start
LH: loop header
LB: loop body
LE: loop exit
PB: predicated region body
PF: predicated region fallthrough
CT: control target
= control target key end

     0   :  { %s773_s0 = inlined_call_operand.vmem [shape: f32[16,128], index: 0, kind: input, shape index: {}]   ;;  %s774_s1 = inlined_call_operand.vmem [shape: f32[128,64], index: 1, kind: input, shape index: {}]   ;;  %s775_s2 = inlined_call_operand.hbm [shape: f32[16,64], index: 2, kind: output, shape index: {}]  }
   0x1   :  { %v35_v0 = vld [vmem:[%s774_s1 + $0x78] sm:$0xff]  ;;  %v34_v1 = vld [vmem:[%s774_s1 + $0x70] sm:$0xff]  ;;  %v33_v2 = vld [vmem:[%s774_s1 + $0x68] sm:$0xff] }
   0x2   :  { %v521_v3 = vand.u32 4294901760, %v35_v0  ;;  %v523_v4 = vand.u32 4294901760, %v34_v1  ;;  %v525_v5 = vand.u32 4294901760, %v33_v2  ;;  %v32_v6 = vld [vmem:[%s774_s1 + $0x60] sm:$0xff]  ;;  %v31_v7 = vld [vmem:[%s774_s1 + $0x58] sm:$0xff]  ;;  %v30_v8 = vld [vmem:[%s774_s1 + $0x50] sm:$0xff] }
   0x3   :  { %v536_v9 = vand.u32 4294901760, %v32_v6  ;;  %v538_v10 = vand.u32 4294901760, %v31_v7  ;;  %v540_v11 = vand.u32 4294901760, %v30_v8  ;;  %v29_v12 = vld [vmem:[%s774_s1 + $0x48] sm:$0xff]  ;;  %v28_v13 = vld [vmem:[%s774_s1 + $0x40] sm:$0xff]  ;;  %v27_v18 = vld [vmem:[%s774_s1 + $0x38] sm:$0xff] }
   0x4   :  { %39 = vmatpush.msra.mxu0 %v521_v3  ;;  %v88_v14 = vsub.f32 %v35_v0, %v521_v3  ;;  %v94_v15 = vsub.f32 %v34_v1, %v523_v4  ;;  %252 = vmatpush.msra.mxu3 %v521_v3  ;;  %v100_v16 = vsub.f32 %v33_v2, %v525_v5  ;;  %v553_v17 = vand.u32 4294901760, %v29_v12  ;;  %v26_v26 = vld [vmem:[%s774_s1 + $0x30] sm:$0xff] }
   0x5   :  { %v106_v19 = vsub.f32 %v32_v6, %v536_v9  ;;  %v112_v20 = vsub.f32 %v31_v7, %v538_v10  ;;  %v560_v21 = vand.u32 4294901760, %v28_v13  ;;  %v118_v25 = vsub.f32 %v30_v8, %v540_v11 }
   0x6   :  { %41 = vmatpush.msra.mxu0 %v523_v4  ;;  %194 = vmatpush.msra.mxu2 %v88_v14  ;;  %v563_v22 = vand.u32 4294901760, %v88_v14  ;;  %v565_v23 = vand.u32 4294901760, %v94_v15  ;;  %v567_v24 = vand.u32 4294901760, %v100_v16 }
   0x7   :  { %7 = vsyncpa [#allocation3], 0  ;;  %254 = vmatpush.msra.mxu3 %v523_v4  ;;  %v574_v27 = vand.u32 4294901760, %v106_v19  ;;  %v124_v28 = vsub.f32 %v29_v12, %v553_v17  ;;  %v577_v29 = vand.u32 4294901760, %v27_v18  ;;  %v583_v33 = vand.u32 4294901760, %v112_v20  ;;  %v25_v36 = vld [vmem:[%s774_s1 + $0x28] sm:$0xff] }
   0x8   :  { %43 = vmatpush.msra.mxu0 %v525_v5  ;;  %197 = vmatpush.msra.mxu2 %v94_v15  ;;  %v90_v30 = vsub.f32 %v88_v14, %v563_v22  ;;  %v96_v31 = vsub.f32 %v94_v15, %v565_v23  ;;  %v102_v32 = vsub.f32 %v100_v16, %v567_v24  ;;  %v587_v35 = vand.u32 4294901760, %v26_v26  ;;  %v24_v42 = vld [vmem:[%s774_s1 + $0x20] sm:$0xff]  ;;  %v23_v48 = vld [vmem:[%s774_s1 + $0x18] sm:$0xff]  ;;  %v22_v54 = vld [vmem:[%s774_s1 + $0x10] sm:$0xff]  ;;  %s420_s19 = sshll.u32 %s775_s2, 4  ;;  %s495_s20 = smov 128   ;;  %s421_s19 = int_to_ptr.hbm [resolvable:$true] %s420_s19 }
   0x9   :  { %256 = vmatpush.msra.mxu3 %v525_v5  ;;  %v130_v34 = vsub.f32 %v28_v13, %v560_v21  ;;  %v108_v39 = vsub.f32 %v106_v19, %v574_v27  ;;  %v594_v40 = vand.u32 4294901760, %v118_v25  ;;  %v597_v41 = vand.u32 4294901760, %v124_v28  ;;  %v21_v60 = vld [vmem:[%s774_s1 + $0x8] sm:$0xff]  ;;  %v20_v2 = vld [vmem:[%s774_s1] sm:$0xff]  ;;  %s496_s21 = smov 8  }
   0xa   :  { %45 = vmatpush.msra.mxu0 %v536_v9  ;;  %200 = vmatpush.msra.mxu2 %v100_v16  ;;  %v91_v37 = vand.u32 4294901760, %v90_v30  ;;  %v97_v38 = vand.u32 4294901760, %v96_v31  ;;  %v103_v43 = vand.u32 4294901760, %v102_v32  ;;  %v114_v44 = vsub.f32 %v112_v20, %v583_v33 }
   0xb   :  { %258 = vmatpush.msra.mxu3 %v536_v9  ;;  %v136_v45 = vsub.f32 %v27_v18, %v577_v29  ;;  %v605_v46 = vand.u32 4294901760, %v25_v36  ;;  %v608_v47 = vand.u32 4294901760, %v130_v34  ;;  %v109_v49 = vand.u32 4294901760, %v108_v39 }
   0xc   :  { %47 = vmatpush.msra.mxu0 %v538_v10  ;;  %92 = vmatpush.msra.mxu1 %v91_v37  ;;  %v120_v50 = vsub.f32 %v118_v25, %v594_v40  ;;  %v142_v51 = vsub.f32 %v26_v26, %v587_v35  ;;  %v616_v52 = vand.u32 4294901760, %v24_v42  ;;  %v126_v53 = vsub.f32 %v124_v28, %v597_v41 }
   0xd   :  { %203 = vmatpush.msra.mxu2 %v106_v19  ;;  %260 = vmatpush.msra.mxu3 %v538_v10  ;;  %v115_v55 = vand.u32 4294901760, %v114_v44  ;;  %v148_v56 = vsub.f32 %v25_v36, %v605_v46  ;;  %v625_v57 = vand.u32 4294901760, %v23_v48  ;;  %v627_v58 = vand.u32 4294901760, %v136_v45 }
   0xe   :  { %49 = vmatpush.msra.mxu0 %v540_v11  ;;  %98 = vmatpush.msra.mxu1 %v97_v38  ;;  %v132_v59 = vsub.f32 %v130_v34, %v608_v47  ;;  %v121_v61 = vand.u32 4294901760, %v120_v50  ;;  %v154_v62 = vsub.f32 %v24_v42, %v616_v52  ;;  %v636_v63 = vand.u32 4294901760, %v22_v54  ;;  %v18_v38 = vld [vmem:[%s773_s0] sm:$0xff] }
   0xf   :  { %206 = vmatpush.msra.mxu2 %v112_v20  ;;  %262 = vmatpush.msra.mxu3 %v540_v11  ;;  %v638_v0 = vand.u32 4294901760, %v142_v51  ;;  %v127_v1 = vand.u32 4294901760, %v126_v53  ;;  %v138_v6 = vsub.f32 %v136_v45, %v627_v58  ;;  %v160_v7 = vsub.f32 %v23_v48, %v625_v57 }
  0x10   :  { %51 = vmatpush.msra.mxu0 %v553_v17  ;;  %104 = vmatpush.msra.mxu1 %v103_v43  ;;  %v647_v8 = vand.u32 4294901760, %v21_v60  ;;  %v649_v12 = vand.u32 4294901760, %v148_v56  ;;  %v133_v13 = vand.u32 4294901760, %v132_v59  ;;  %v166_v15 = vsub.f32 %v22_v54, %v636_v63 }
  0x11   :  { %209 = vmatpush.msra.mxu2 %v118_v25  ;;  %264 = vmatpush.msra.mxu3 %v553_v17  ;;  %v144_v14 = vsub.f32 %v142_v51, %v638_v0  ;;  %v655_v16 = vand.u32 4294901760, %v20_v2  ;;  %v657_v18 = vand.u32 4294901760, %v154_v62  ;;  %v139_v19 = vand.u32 4294901760, %v138_v6 }
  0x12   :  { %53 = vmatpush.msra.mxu0 %v560_v21  ;;  %110 = vmatpush.msra.mxu1 %v109_v49  ;;  %v150_v20 = vsub.f32 %v148_v56, %v649_v12  ;;  %v172_v25 = vsub.f32 %v21_v60, %v647_v8  ;;  %v663_v26 = vand.u32 4294901760, %v160_v7  ;;  %v669_v32 = vand.u32 4294901760, %v166_v15 }
  0x13   :  { %212 = vmatpush.msra.mxu2 %v124_v28  ;;  %266 = vmatpush.msra.mxu3 %v560_v21  ;;  %v145_v28 = vand.u32 4294901760, %v144_v14  ;;  %v156_v30 = vsub.f32 %v154_v62, %v657_v18  ;;  %v178_v31 = vsub.f32 %v20_v2, %v655_v16  ;;  %v685_v44 = vand.u32 4294901760, %v18_v38 }
  0x14   :  { %55 = vmatpush.msra.mxu0 %v577_v29  ;;  %116 = vmatpush.msra.mxu1 %v115_v55  ;;  %v162_v36 = vsub.f32 %v160_v7, %v663_v26  ;;  %v674_v37 = vand.u32 4294901760, %v172_v25  ;;  %v168_v42 = vsub.f32 %v166_v15, %v669_v32  ;;  %v19_v55 = vld [vmem:[%s773_s0 + $0x8] sm:$0xff]  ;;  %s494_s0 = smov [#allocation2]  }
  0x15   :  { %215 = vmatpush.msra.mxu2 %v130_v34  ;;  %268 = vmatpush.msra.mxu3 %v577_v29  ;;  %v151_v34 = vand.u32 4294901760, %v150_v20  ;;  %v157_v39 = vand.u32 4294901760, %v156_v30  ;;  %v682_v43 = vand.u32 4294901760, %v178_v31  ;;  %v705_v59 = vand.u32 4294901760, %v19_v55  ;;  %s418_s16 = sshll.u32 %s494_s0, 4  ;;  %s419_s16 = int_to_ptr.vmem [resolvable:$true] %s418_s16 }
  0x16   :  { %57 = vmatpush.msra.mxu0 %v587_v35  ;;  %122 = vmatpush.msra.mxu1 %v121_v61  ;;  %v174_v48 = vsub.f32 %v172_v25, %v674_v37  ;;  %v169_v49 = vand.u32 4294901760, %v168_v42 }
  0x17   :  { %218 = vmatpush.msra.mxu2 %v136_v45  ;;  %270 = vmatpush.msra.mxu3 %v587_v35  ;;  %v163_v45 = vand.u32 4294901760, %v162_v36  ;;  %v180_v50 = vsub.f32 %v178_v31, %v682_v43 }
  0x18   :  { %59 = vmatpush.msra.mxu0 %v605_v46  ;;  %128 = vmatpush.msra.mxu1 %v127_v1  ;;  %v175_v53 = vand.u32 4294901760, %v174_v48 }
  0x19   :  { %221 = vmatpush.msra.mxu2 %v142_v51  ;;  %272 = vmatpush.msra.mxu3 %v605_v46  ;;  %v71_v51 = vsub.f32 %v18_v38, %v685_v44  ;;  %v181_v54 = vand.u32 4294901760, %v180_v50 }
  0x1a   :  { %61 = vmatpush.msra.mxu0 %v616_v52  ;;  %134 = vmatpush.msra.mxu1 %v133_v13 }
  0x1b   :  { %224 = vmatpush.msra.mxu2 %v148_v56  ;;  %274 = vmatpush.msra.mxu3 %v616_v52  ;;  %v72_v56 = vand.u32 4294901760, %v71_v51 }
  0x1c   :  { %63 = vmatpush.msra.mxu0 %v625_v57  ;;  %140 = vmatpush.msra.mxu1 %v139_v19 }
  0x1d   :  { %227 = vmatpush.msra.mxu2 %v154_v62  ;;  %276 = vmatpush.msra.mxu3 %v625_v57 }
  0x1e   :  { %65 = vmatpush.msra.mxu0 %v636_v63  ;;  %146 = vmatpush.msra.mxu1 %v145_v28 }
  0x1f   :  { %230 = vmatpush.msra.mxu2 %v160_v7  ;;  %278 = vmatpush.msra.mxu3 %v636_v63 }
  0x20   :  { %67 = vmatpush.msra.mxu0 %v647_v8  ;;  %152 = vmatpush.msra.mxu1 %v151_v34 }
  0x21   :  { %233 = vmatpush.msra.mxu2 %v166_v15  ;;  %280 = vmatpush.msra.mxu3 %v647_v8 }
  0x22   :  { %69 = vmatpush.msra.mxu0 %v655_v16  ;;  %158 = vmatpush.msra.mxu1 %v157_v39 }
  0x23   :  { %236 = vmatpush.msra.mxu2 %v172_v25  ;;  %282 = vmatpush.msra.mxu3 %v655_v16 }
  0x24   :  { %299 = vmatpush.msrb.mxu0 %v563_v22  ;;  %164 = vmatpush.msra.mxu1 %v163_v45 }
  0x25   :  { %239 = vmatpush.msra.mxu2 %v178_v31  ;;  %448 = vmatpush.msrb.mxu3 %v521_v3 }
  0x26   :  { %303 = vmatpush.msrb.mxu0 %v565_v23  ;;  %170 = vmatpush.msra.mxu1 %v169_v49 }
  0x27   :  { %432 = vmatpush.msrb.mxu2 %v563_v22  ;;  %449 = vmatpush.msrb.mxu3 %v523_v4  ;;  %v73_v22 = vsub.f32 %v71_v51, %v72_v56 }
  0x28   :  { %307 = vmatpush.msrb.mxu0 %v567_v24  ;;  %176 = vmatpush.msra.mxu1 %v175_v53 }
  0x29   :  { %433 = vmatpush.msrb.mxu2 %v565_v23  ;;  %450 = vmatpush.msrb.mxu3 %v525_v5  ;;  %v79_v23 = vsub.f32 %v19_v55, %v705_v59 }
  0x2a   :  { %311 = vmatpush.msrb.mxu0 %v574_v27  ;;  %182 = vmatpush.msra.mxu1 %v181_v54 }
  0x2b   :  { %434 = vmatpush.msrb.mxu2 %v567_v24  ;;  %451 = vmatpush.msrb.mxu3 %v536_v9 }
  0x2c   :  { %315 = vmatpush.msrb.mxu0 %v583_v33  ;;  %370 = vmatpush.msrb.mxu1 %v521_v3  ;;  %v74_v3 = vand.u32 4294901760, %v73_v22 }
  0x2d   :  { %435 = vmatpush.msrb.mxu2 %v574_v27  ;;  %452 = vmatpush.msrb.mxu3 %v538_v10 }
  0x2e   :  { %319 = vmatpush.msrb.mxu0 %v594_v40  ;;  %372 = vmatpush.msrb.mxu1 %v523_v4  ;;  %v80_v4 = vand.u32 4294901760, %v79_v23 }
  0x2f   :  { %436 = vmatpush.msrb.mxu2 %v583_v33  ;;  %453 = vmatpush.msrb.mxu3 %v540_v11 }
  0x30   :  { %323 = vmatpush.msrb.mxu0 %v597_v41  ;;  %374 = vmatpush.msrb.mxu1 %v525_v5  ;;  %v81_v5 = vsub.f32 %v79_v23, %v80_v4 }
  0x31   :  { %437 = vmatpush.msrb.mxu2 %v594_v40  ;;  %75 = vmatmul.f32.vlgmr.msra.gmra.mxu0 %v74_v3 }
  0x32   :  { %327 = vmatpush.msrb.mxu0 %v608_v47  ;;  %376 = vmatpush.msrb.mxu1 %v536_v9  ;;  %v82_v9 = vand.u32 4294901760, %v81_v5 }
  0x33   :  { %438 = vmatpush.msrb.mxu2 %v597_v41  ;;  %454 = vmatpush.msrb.mxu3 %v553_v17 }
  0x34   :  { %378 = vmatpush.msrb.mxu1 %v538_v10  ;;  %331 = vmatpush.msrb.mxu0 %v627_v58 }
  0x35   :  { %439 = vmatpush.msrb.mxu2 %v608_v47  ;;  %455 = vmatpush.msrb.mxu3 %v560_v21 }
  0x36   :  { %242 = vmatmul.f32.vlgmr.msra.gmra.mxu2 %v71_v51  ;;  %335 = vmatpush.msrb.mxu0 %v638_v0 }
  0x37   :  { %440 = vmatpush.msrb.mxu2 %v627_v58  ;;  %380 = vmatpush.msrb.mxu1 %v540_v11 }
  0x38   :  { %286 = vmatmul.f32.vlgmr.msra.gmra.mxu3 %v72_v56  ;;  %339 = vmatpush.msrb.mxu0 %v649_v12 }
  0x39   :  { %441 = vmatpush.msrb.mxu2 %v638_v0  ;;  %382 = vmatpush.msrb.mxu1 %v553_v17 }
  0x3a   :  { %456 = vmatpush.msrb.mxu3 %v577_v29  ;;  %184 = vmatmul.f32.vlgmr.msra.gmra.mxu1 %v685_v44 }
  0x3b   :  { %442 = vmatpush.msrb.mxu2 %v649_v12  ;;  %343 = vmatpush.msrb.mxu0 %v657_v18 }
  0x3c   :  { %384 = vmatpush.msrb.mxu1 %v560_v21  ;;  %457 = vmatpush.msrb.mxu3 %v587_v35 }
  0x3d   :  { %83 = vmatmul.f32.gmra.mxu0 %v82_v9  ;;  %443 = vmatpush.msrb.mxu2 %v657_v18 }
  0x3e   :  { %347 = vmatpush.msrb.mxu0 %v663_v26  ;;  %386 = vmatpush.msrb.mxu1 %v577_v29 }
  0x3f   :  { %458 = vmatpush.msrb.mxu3 %v605_v46  ;;  %247 = vmatmul.f32.gmra.mxu2 %v79_v23 }
  0x40   :  { %444 = vmatpush.msrb.mxu2 %v663_v26  ;;  %351 = vmatpush.msrb.mxu0 %v669_v32 }
  0x41   :  { %388 = vmatpush.msrb.mxu1 %v587_v35  ;;  %459 = vmatpush.msrb.mxu3 %v616_v52 }
  0x42   :  { %292 = vmatmul.f32.gmra.mxu3 %v80_v4  ;;  %445 = vmatpush.msrb.mxu2 %v669_v32 }
  0x43   :  { %355 = vmatpush.msrb.mxu0 %v674_v37  ;;  %390 = vmatpush.msrb.mxu1 %v605_v46 }
  0x44   :  { %460 = vmatpush.msrb.mxu3 %v625_v57  ;;  %188 = vmatmul.f32.gmra.mxu1 %v705_v59 }
  0x45   :  { %446 = vmatpush.msrb.mxu2 %v674_v37  ;;  %359 = vmatpush.msrb.mxu0 %v682_v43 }
  0x46   :  { %392 = vmatpush.msrb.mxu1 %v616_v52  ;;  %461 = vmatpush.msrb.mxu3 %v636_v63 }
  0x47   :  { %361 = vmatmul.f32.vlgmr.msrb.gmra.mxu0 %v685_v44  ;;  %447 = vmatpush.msrb.mxu2 %v682_v43 }
  0x48   :  { %394 = vmatpush.msrb.mxu1 %v625_v57  ;;  %462 = vmatpush.msrb.mxu3 %v647_v8 }
  0x49   :  { %365 = vmatmul.f32.vlgmr.msrb.gmra.mxu2 %v705_v59 }
  0x4a   :  { %396 = vmatpush.msrb.mxu1 %v636_v63  ;;  %463 = vmatpush.msrb.mxu3 %v655_v16 }
  0x4b   :  { %406 = vmatmul.f32.vlgmr.msrb.gmra.mxu3 %v705_v59 }
  0x4c   :  { %398 = vmatpush.msrb.mxu1 %v647_v8 }
  0x4e   :  { %400 = vmatpush.msrb.mxu1 %v655_v16 }
  0x4f   :  { %402 = vmatmul.f32.vlgmr.msrb.gmra.mxu1 %v685_v44 }
  0xae   :  { %v76_v10 = vpop.f32.mrf.mxu0 }
  0xb7   :  { %v185_v11 = vpop.f32.mrf.mxu1 }
  0xb8   :  { %v186_v27 = vadd.f32 %v185_v11, %v76_v10 }
  0xb9   :  { %v243_v17 = vpop.f32.mrf.mxu2 }
  0xba   :  { %v84_v24 = vpop.f32.mrf.mxu0  ;;  %v244_v40 = vadd.f32 %v243_v17, %v186_v27 }
  0xbb   :  { %v287_v21 = vpop.f32.mrf.mxu3 }
  0xbc   :  { %v288_v52 = vadd.f32 %v287_v21, %v244_v40 }
  0xc1   :  { %v189_v29 = vpop.f32.mrf.mxu1 }
  0xc2   :  { %v248_v33 = vpop.f32.mrf.mxu2  ;;  %v190_v35 = vadd.f32 %v189_v29, %v84_v24 }
  0xc4   :  { %v249_v46 = vadd.f32 %v248_v33, %v190_v35  ;;  %v362_v47 = vpop.f32.mrf.mxu0 }
  0xc5   :  { %v293_v41 = vpop.f32.mrf.mxu3  ;;  %v363_v57 = vadd.f32 %v362_v47, %v288_v52 }
  0xc6   :  { %v294_v58 = vadd.f32 %v293_v41, %v249_v46 }
  0xcc   :  { %v366_v60 = vpop.f32.mrf.mxu2  ;;  %v403_v61 = vpop.f32.mrf.mxu1 }
  0xcd   :  { %v367_v62 = vadd.f32 %v366_v60, %v294_v58  ;;  %v404_v63 = vadd.f32 %v403_v61, %v363_v57 }
  0xce   :  { %v407_v0 = vpop.f32.mrf.mxu3 }
  0xcf   :  { %v408_v1 = vadd.f32 %v407_v0, %v367_v62  ;;  %412 = vst [vmem:[#allocation2] sm:$0xff] %v404_v63 }
  0xd1   :  { %413 = vst [vmem:[#allocation2 + $0x8] sm:$0xff] %v408_v1 }
  0xd2   :  { %426 = dma.vmem_to_hbm [thread:$0]  %s419_s16, 256, %s421_s19, [#allocation3], %s495_s20, %s495_s20, %s496_s21  }
  0xd3   :  { %492 = dma.done.wait [#allocation3], 256  }
  0xd4   :  { %493 = vsyncadd [#allocation3], 4294967040 }
  0xd5   :  { %431 = vsyncpa [#allocation3], 1 }

</bundles_post_ra>
